<compile_context>
chip_gen: v7x
topology: tpu7x:2x2x1
jax: 0.10.0
libtpu: 0.0.40
codegen_flags: <defaults>
</compile_context>

<pallas_src>
from functools import partial

import jax
import jax.numpy as jnp
from jax import random
from jax.scipy import special as jsp_special
from jax.experimental import pallas as pl
from jax.experimental.pallas import tpu as pltpu

ALPHA = 0.1                       # residual mixing coeff (GraphConvolution & CU_GCN)
GCN_K = 2                         # SGConv K inside GraphConvolution
PROP_C = (1.0 - ALPHA) / GCN_K    # propagation scale (1-alpha)/K
TEMP = 0.6                        # RelaxedBernoulli temperature
BB_ALPHA = 0.8                    # BBEdge_pred prior alpha
EULER = 0.577215664901532


# ----------------------------- fused Pallas kernel ---------------------------

def _cu_gcn_fused_kernel(x_ref, lw_ref, lb_ref, adj_ref, m0_ref, mblk_ref,
                         fcw_ref, fcb_ref, o_ref, *, nblock):
    """Fused CU_GCN forward.

    x_ref    : (N, Kpad)        node feats, per-graph F0 blocks on lanes (zero-padded)
    lw_ref   : (Kpad, B*H)      block-diag Linear(5,128) weight (zero-padded rows)
    lb_ref   : (1, B*H)         Linear bias tiled per graph
    adj_ref  : (N, N)           normalized adjacency (shared across batch)
    m0_ref   : (N, N)           layer-0 BB edge mask
    mblk_ref : (nblock, N, N)   per-block BB edge masks of the final layer
    fcw_ref  : (B*H, B*NC)      block-diag fc(128,3) weight
    fcb_ref  : (1, B*NC)        fc bias tiled per graph
    o_ref    : (1, B*NC)        per-graph logits, flattened on lanes
    """
    N = adj_ref.shape[0]
    adj = adj_ref[...]

    # (1) Hoisted Linear: per-graph x_b @ W as one block-diagonal matmul
    #     -> everything below is lane-dense (N, B*128).
    y = jnp.dot(x_ref[...], lw_ref[...], preferred_element_type=jnp.float32)

    # (2) GCN layer 0 (BB-masked adjacency), layer 1 (plain adjacency):
    #     y <- alpha*y + (1-alpha)/K * (A @ y)     (== gcn(x) @ W by linearity)
    a0 = m0_ref[...] * adj
    y = ALPHA * y + PROP_C * jnp.dot(a0, y, preferred_element_type=jnp.float32)
    y = ALPHA * y + PROP_C * jnp.dot(adj, y, preferred_element_type=jnp.float32)
    # (the torch model also accumulates an `emb` tensor here, but for nlay==2 it
    #  is overwritten / never returned -> dead code, dropped.)

    # (3) Block loop of the final layer:
    #     j==0 : out = relu(lin(gcn_mask0(x)))
    #     j>=1 : out = relu(out + lin(gcn_maskj(x)))
    bias = jnp.broadcast_to(lb_ref[...], y.shape)   # bias broadcast hoisted out of loop
    out = None
    for j in range(nblock):                         # static unroll, nblock is compile-time
        aj = mblk_ref[j] * adj
        g = (ALPHA * y
             + PROP_C * jnp.dot(aj, y, preferred_element_type=jnp.float32)
             + bias)
        out = g if j == 0 else out + g
        out = jnp.maximum(out, 0.0)

    # (4) global_add_pool over nodes as a ones-row matmul (keeps the reduction
    #     on the otherwise-idle MXU), then block-diagonal fc epilogue.
    pooled = jnp.dot(jnp.ones((1, N), jnp.float32), out,
                     preferred_element_type=jnp.float32)          # (1, B*H)
    o_ref[...] = (jnp.dot(pooled, fcw_ref[...],
                          preferred_element_type=jnp.float32)
                  + fcb_ref[...]).astype(o_ref.dtype)


# -------------------------- BBEdge_pred (plain JAX glue) ---------------------

def bb_get_params(a_uc, b_uc):
    a = jax.nn.softplus(jnp.clip(a_uc, -10.0, None))
    b = jax.nn.softplus(jnp.clip(b_uc, -10.0, 50.0))
    return a, b


def bb_sample_pi(a_uc, b_uc, key):
    a, b = bb_get_params(a_uc, b_uc)
    u = jnp.clip(random.uniform(key, a_uc.shape), 1e-6, 1.0 - 1e-6)
    return (1.0 - u ** (1.0 / b)) ** (1.0 / a)


def bb_get_weight(a_uc, b_uc, num_samps, key):
    # RelaxedBernoulli(temp, probs=pi).rsample([num_samps])
    kpi, kz = random.split(key)
    pi = bb_sample_pi(a_uc, b_uc, kpi)                       # (1,)
    logits = jnp.log(pi) - jnp.log1p(-pi)
    u = jnp.clip(random.uniform(kz, (num_samps, 1)), 1e-6, 1.0 - 1e-6)
    z = jax.nn.sigmoid((logits + jnp.log(u) - jnp.log1p(-u)) / TEMP)
    return jnp.squeeze(z), pi                                # (num_samps,), (1,)


def bb_get_reg(a_uc, b_uc, kl_scale=1.0):
    a, b = bb_get_params(a_uc, b_uc)
    kld = ((1.0 - BB_ALPHA / a) * (-EULER - jsp_special.digamma(b) - 1.0 / b)
           + jnp.log(a * b + 1e-10) - jnp.log(BB_ALPHA) - (b - 1.0) / b)
    return kl_scale * jnp.sum(kld)


# --------------------------------- glue --------------------------------------

def _normalized_adj(edge_weight_tril, N, dtype):
    # Dense symmetric edge weights from the lower-triangular parameter, then
    # CU_GCN.norm (abs-degree symmetric normalization; the complete graph
    # already carries self-loops so add_remaining_self_loops is a no-op).
    xs, ys = jnp.tril_indices(N)
    W = jnp.zeros((N, N), dtype).at[xs, ys].set(edge_weight_tril)
    W = W + W.T - jnp.diag(jnp.diag(W))
    deg = jnp.sum(jnp.abs(W), axis=1)
    dis = jnp.where(deg > 0.0, deg ** -0.5, 0.0)
    return dis[:, None] * W * dis[None, :]


# ------------------------------- CU_GCN forward ------------------------------

@partial(jax.jit, static_argnames=("batch_size", "num_nodes", "nlay", "nblock"))
def cu_gcn_forward(params, x_nodes, key, batch_size, num_nodes, nlay, nblock):
    assert nlay == 2, "only the nlay == 2 configuration is implemented"
    # TODO(synk): the intermediate-layer path (0 < i < nlay-1) slices x into
    # feat_pblock columns, which is incompatible with Linear(5, 128) in the
    # original module; only nlay == 2 (no intermediate layers) is supported.
    B, N = batch_size, num_nodes
    n2 = N * N
    F0 = x_nodes.shape[1]
    H = params["lin_w"].shape[1]
    NC = params["fc_w"].shape[1]
    dt = x_nodes.dtype

    adj = _normalized_adj(params["edge_weight"], N, dt)

    # BB edge-mask sampling + KL regularizer (scalar RNG glue).
    keys = random.split(key, nlay)
    z0, pi0 = bb_get_weight(params["a_uc"][0:1], params["b_uc"][0:1], nblock * n2, keys[0])
    z1, pi1 = bb_get_weight(params["a_uc"][1:2], params["b_uc"][1:2], nblock * n2, keys[1])
    kld_loss = (bb_get_reg(params["a_uc"][0:1], params["b_uc"][0:1])
                + bb_get_reg(params["a_uc"][1:2], params["b_uc"][1:2]))
    drop_rates = jnp.stack([pi0, pi1])                        # (nlay, 1)

    mask0 = z0[:n2].reshape(N, N)                             # layer-0 mask
    mask_blk = z1.reshape(nblock, N, N)                       # per-block masks

    # Node features -> (N, B*F0): nodes on sublanes, per-graph F0 blocks on
    # lanes; pad the contraction dim up to a multiple of 8 sublanes.
    x_t = x_nodes.reshape(B, N, F0).transpose(1, 0, 2).reshape(N, B * F0)
    kdim = B * F0
    kpad = -(-kdim // 8) * 8
    x_t = jnp.pad(x_t, ((0, 0), (0, kpad - kdim)))

    eye_b = jnp.eye(B, dtype=dt)
    lw_blk = jnp.pad(jnp.kron(eye_b, params["lin_w"]), ((0, kpad - kdim), (0, 0)))
    lb_blk = jnp.tile(params["lin_b"], B).reshape(1, B * H)
    fcw_blk = jnp.kron(eye_b, params["fc_w"])                 # (B*H, B*NC)
    fcb_blk = jnp.tile(params["fc_b"], B).reshape(1, B * NC)

    # One fused kernel: xW hoist -> 2 propagation layers -> nblock masked
    # propagations + bias + residual-ReLU -> pool -> fc.  Everything fits VMEM
    # at this size, so no grid is used.  (For large N/B: add a 'parallel' grid
    # axis over batch/node tiles and stream the mask stack from HBM.)
    vmem_spec = pl.BlockSpec(memory_space=pltpu.MemorySpace.VMEM)
    out_flat = pl.pallas_call(
        partial(_cu_gcn_fused_kernel, nblock=nblock),
        out_shape=jax.ShapeDtypeStruct((1, B * NC), dt),
        in_specs=[vmem_spec] * 8,
        out_specs=vmem_spec,
        compiler_params=pltpu.CompilerParams(vmem_limit_bytes=64 << 20),
    )(x_t, lw_blk, lb_blk, adj, mask0, mask_blk, fcw_blk, fcb_blk)

    output = out_flat.reshape(B, NC)
    # output dropout is identity in eval mode.
    return output, kld_loss, drop_rates


# ----------------------- pure-JAX reference (un-hoisted) ---------------------

def cu_gcn_reference(params, x_nodes, key, batch_size, num_nodes, nlay, nblock):
    B, N = batch_size, num_nodes
    n2 = N * N
    F0 = x_nodes.shape[1]
    adj = _normalized_adj(params["edge_weight"], N, x_nodes.dtype)
    keys = random.split(key, nlay)
    z0, pi0 = bb_get_weight(params["a_uc"][0:1], params["b_uc"][0:1], nblock * n2, keys[0])
    z1, pi1 = bb_get_weight(params["a_uc"][1:2], params["b_uc"][1:2], nblock * n2, keys[1])
    kld = (bb_get_reg(params["a_uc"][0:1], params["b_uc"][0:1])
           + bb_get_reg(params["a_uc"][1:2], params["b_uc"][1:2]))
    x = x_nodes.reshape(B, N, F0)
    a0 = z0[:n2].reshape(N, N) * adj
    x = ALPHA * x + PROP_C * jnp.einsum("mn,bnf->bmf", a0, x)
    x = ALPHA * x + PROP_C * jnp.einsum("mn,bnf->bmf", adj, x)
    out = None
    for j in range(nblock):
        aj = z1[j * n2:(j + 1) * n2].reshape(N, N) * adj
        g = ALPHA * x + PROP_C * jnp.einsum("mn,bnf->bmf", aj, x)
        lin_g = jnp.einsum("bnf,fh->bnh", g, params["lin_w"]) + params["lin_b"]
        out = lin_g if j == 0 else out + lin_g
        out = jnp.maximum(out, 0.0)
    pooled = out.sum(axis=1)
    output = pooled @ params["fc_w"] + params["fc_b"]
    return output, kld, jnp.stack([pi0, pi1])


# ------------------------------------ main -----------------------------------

if __name__ == "__main__":
    key = random.PRNGKey(0)
    B, N = 2, 8                      # batch graphs, nodes per graph
    nlay, nblock = 2, 2
    nfeat_list = [5, 4, 4]           # len == nlay + 1 ; lin is Linear(5, 128)

    ks = random.split(key, 9)
    adj0 = random.uniform(ks[0], (N, N), jnp.float32)
    xs, ys = jnp.tril_indices(N)

    params = {
        "edge_weight": adj0[xs, ys],                                           # tril params
        "a_uc": random.uniform(ks[1], (nlay,), jnp.float32, 1.0, 1.5),         # per-layer BBEdge
        "b_uc": random.uniform(ks[2], (nlay,), jnp.float32, 0.49, 0.51),
        "lin_w": (random.uniform(ks[3], (5, 128), jnp.float32) - 0.5) * 0.8,   # Linear(5,128)
        "lin_b": (random.uniform(ks[4], (128,), jnp.float32) - 0.5) * 0.8,
        "fc_w": (random.uniform(ks[5], (128, 3), jnp.float32) - 0.5) * 0.17,   # Linear(128,3)
        "fc_b": (random.uniform(ks[6], (3,), jnp.float32) - 0.5) * 0.17,
    }

    x = random.normal(ks[7], (B * N, nfeat_list[0]), jnp.float32)   # data.x
    fwd_key = ks[8]                                                 # sampling randomness

    output, kld_loss, drop_rates = cu_gcn_forward(
        params, x, fwd_key, batch_size=B, num_nodes=N, nlay=nlay, nblock=nblock)
    jax.block_until_ready((output, kld_loss, drop_rates))

    # Validate the fused/hoisted kernel against the un-hoisted pure-JAX reference.
    ref_out, ref_kld, ref_dr = cu_gcn_reference(
        params, x, fwd_key, batch_size=B, num_nodes=N, nlay=nlay, nblock=nblock)

    assert output.shape == (B, 3)
    assert drop_rates.shape == (nlay, 1)
    assert output.dtype == jnp.float32
    assert jnp.allclose(output, ref_out, rtol=5e-2, atol=5e-2), (output, ref_out)
    assert jnp.allclose(drop_rates, ref_dr, rtol=1e-3, atol=1e-3)
    assert jnp.allclose(kld_loss, ref_kld, rtol=1e-3, atol=1e-3)
    print("KERNEL_OK")
</pallas_src>

<mosaic_0001>
module attributes {stable_mosaic.version = 11 : i64} {
  func.func private @main(%arg0: i32) attributes {dimension_semantics = [#tpu.dimension_semantics<core_parallel>], iteration_bounds = array<i64: 2>, tpu.core_type = #tpu.core_type<sc_scalar_subcore>, window_params = []} {
    return
  }
}

module attributes {stable_mosaic.version = 11 : i64} {
  func.func private @main(%arg0: i32) attributes {dimension_semantics = [#tpu.dimension_semantics<core_parallel>], iteration_bounds = array<i64: 2>, tpu.core_type = #tpu.core_type<sc_scalar_subcore>, window_params = []} {
    return
  }
}

module attributes {stable_mosaic.version = 11 : i64} {
  func.func @_cu_gcn_fused_kernel(%arg0: memref<8x16xf32, #tpu.memory_space<vmem>>, %arg1: memref<16x256xf32, #tpu.memory_space<vmem>>, %arg2: memref<1x256xf32, #tpu.memory_space<vmem>>, %arg3: memref<8x8xf32, #tpu.memory_space<vmem>>, %arg4: memref<8x8xf32, #tpu.memory_space<vmem>>, %arg5: memref<2x8x8xf32, #tpu.memory_space<vmem>>, %arg6: memref<256x6xf32, #tpu.memory_space<vmem>>, %arg7: memref<1x6xf32, #tpu.memory_space<vmem>>, %arg8: memref<1x6xf32, #tpu.memory_space<vmem>>) attributes {dimension_semantics = [], scalar_prefetch = 0 : i64, scratch_operands = 0 : i64, tpu.core_type = #tpu.core_type<tc>} {
    %c0 = arith.constant 0 : index
    %c0_0 = arith.constant 0 : index
    %0 = vector.load %arg3[%c0, %c0_0] : memref<8x8xf32, #tpu.memory_space<vmem>>, vector<8x8xf32>
    %c0_1 = arith.constant 0 : index
    %c0_2 = arith.constant 0 : index
    %1 = vector.load %arg0[%c0_1, %c0_2] : memref<8x16xf32, #tpu.memory_space<vmem>>, vector<8x16xf32>
    %c0_3 = arith.constant 0 : index
    %c0_4 = arith.constant 0 : index
    %2 = vector.load %arg1[%c0_3, %c0_4] : memref<16x256xf32, #tpu.memory_space<vmem>>, vector<16x256xf32>
    %cst = arith.constant dense<0.000000e+00> : vector<8x256xf32>
    %3 = tpu.matmul %1, %2, %cst {dimension_numbers = #tpu.dot_dimension_numbers<[1], [0], [0], [1], [0, 0, 1, 1], [], []>} : vector<8x16xf32>, vector<16x256xf32>, vector<8x256xf32> -> vector<8x256xf32>
    %c0_5 = arith.constant 0 : index
    %c0_6 = arith.constant 0 : index
    %4 = vector.load %arg4[%c0_5, %c0_6] : memref<8x8xf32, #tpu.memory_space<vmem>>, vector<8x8xf32>
    %5 = arith.mulf %4, %0 : vector<8x8xf32>
    %cst_7 = arith.constant 1.000000e-01 : f32
    %6 = vector.broadcast %cst_7 : f32 to vector<8x256xf32>
    %7 = arith.mulf %6, %3 : vector<8x256xf32>
    %cst_8 = arith.constant dense<0.000000e+00> : vector<8x256xf32>
    %8 = tpu.matmul %5, %3, %cst_8 {dimension_numbers = #tpu.dot_dimension_numbers<[1], [0], [0], [1], [0, 0, 1, 1], [], []>} : vector<8x8xf32>, vector<8x256xf32>, vector<8x256xf32> -> vector<8x256xf32>
    %cst_9 = arith.constant 4.500000e-01 : f32
    %9 = vector.broadcast %cst_9 : f32 to vector<8x256xf32>
    %10 = arith.mulf %9, %8 : vector<8x256xf32>
    %11 = arith.addf %7, %10 : vector<8x256xf32>
    %cst_10 = arith.constant 1.000000e-01 : f32
    %12 = vector.broadcast %cst_10 : f32 to vector<8x256xf32>
    %13 = arith.mulf %12, %11 : vector<8x256xf32>
    %cst_11 = arith.constant dense<0.000000e+00> : vector<8x256xf32>
    %14 = tpu.matmul %0, %11, %cst_11 {dimension_numbers = #tpu.dot_dimension_numbers<[1], [0], [0], [1], [0, 0, 1, 1], [], []>} : vector<8x8xf32>, vector<8x256xf32>, vector<8x256xf32> -> vector<8x256xf32>
    %cst_12 = arith.constant 4.500000e-01 : f32
    %15 = vector.broadcast %cst_12 : f32 to vector<8x256xf32>
    %16 = arith.mulf %15, %14 : vector<8x256xf32>
    %17 = arith.addf %13, %16 : vector<8x256xf32>
    %c0_13 = arith.constant 0 : index
    %c0_14 = arith.constant 0 : index
    %18 = vector.load %arg2[%c0_13, %c0_14] : memref<1x256xf32, #tpu.memory_space<vmem>>, vector<1x256xf32>
    %19 = vector.shape_cast %18 : vector<1x256xf32> to vector<1x256xf32>
    %20 = vector.broadcast %19 : vector<1x256xf32> to vector<8x256xf32>
    %c0_15 = arith.constant 0 : index
    %c0_16 = arith.constant 0 : index
    %c0_17 = arith.constant 0 : index
    %21 = vector.load %arg5[%c0_15, %c0_16, %c0_17] : memref<2x8x8xf32, #tpu.memory_space<vmem>>, vector<1x8x8xf32>
    %22 = vector.shape_cast %21 : vector<1x8x8xf32> to vector<8x8xf32>
    %23 = arith.mulf %22, %0 : vector<8x8xf32>
    %cst_18 = arith.constant 1.000000e-01 : f32
    %24 = vector.broadcast %cst_18 : f32 to vector<8x256xf32>
    %25 = arith.mulf %24, %17 : vector<8x256xf32>
    %cst_19 = arith.constant dense<0.000000e+00> : vector<8x256xf32>
    %26 = tpu.matmul %23, %17, %cst_19 {dimension_numbers = #tpu.dot_dimension_numbers<[1], [0], [0], [1], [0, 0, 1, 1], [], []>} : vector<8x8xf32>, vector<8x256xf32>, vector<8x256xf32> -> vector<8x256xf32>
    %cst_20 = arith.constant 4.500000e-01 : f32
    %27 = vector.broadcast %cst_20 : f32 to vector<8x256xf32>
    %28 = arith.mulf %27, %26 : vector<8x256xf32>
    %29 = arith.addf %25, %28 : vector<8x256xf32>
    %30 = arith.addf %29, %20 : vector<8x256xf32>
    %cst_21 = arith.constant 0.000000e+00 : f32
    %31 = vector.broadcast %cst_21 : f32 to vector<8x256xf32>
    %32 = arith.maximumf %30, %31 : vector<8x256xf32>
    %c1 = arith.constant 1 : index
    %c0_22 = arith.constant 0 : index
    %c0_23 = arith.constant 0 : index
    %33 = vector.load %arg5[%c1, %c0_22, %c0_23] : memref<2x8x8xf32, #tpu.memory_space<vmem>>, vector<1x8x8xf32>
    %34 = vector.shape_cast %33 : vector<1x8x8xf32> to vector<8x8xf32>
    %35 = arith.mulf %34, %0 : vector<8x8xf32>
    %cst_24 = arith.constant 1.000000e-01 : f32
    %36 = vector.broadcast %cst_24 : f32 to vector<8x256xf32>
    %37 = arith.mulf %36, %17 : vector<8x256xf32>
    %cst_25 = arith.constant dense<0.000000e+00> : vector<8x256xf32>
    %38 = tpu.matmul %35, %17, %cst_25 {dimension_numbers = #tpu.dot_dimension_numbers<[1], [0], [0], [1], [0, 0, 1, 1], [], []>} : vector<8x8xf32>, vector<8x256xf32>, vector<8x256xf32> -> vector<8x256xf32>
    %cst_26 = arith.constant 4.500000e-01 : f32
    %39 = vector.broadcast %cst_26 : f32 to vector<8x256xf32>
    %40 = arith.mulf %39, %38 : vector<8x256xf32>
    %41 = arith.addf %37, %40 : vector<8x256xf32>
    %42 = arith.addf %41, %20 : vector<8x256xf32>
    %43 = arith.addf %32, %42 : vector<8x256xf32>
    %cst_27 = arith.constant 0.000000e+00 : f32
    %44 = vector.broadcast %cst_27 : f32 to vector<8x256xf32>
    %45 = arith.maximumf %43, %44 : vector<8x256xf32>
    %cst_28 = arith.constant 1.000000e+00 : f32
    %46 = vector.broadcast %cst_28 : f32 to vector<1x8xf32>
    %cst_29 = arith.constant dense<0.000000e+00> : vector<1x256xf32>
    %47 = tpu.matmul %46, %45, %cst_29 {dimension_numbers = #tpu.dot_dimension_numbers<[1], [0], [0], [1], [0, 0, 1, 1], [], []>} : vector<1x8xf32>, vector<8x256xf32>, vector<1x256xf32> -> vector<1x256xf32>
    %c0_30 = arith.constant 0 : index
    %c0_31 = arith.constant 0 : index
    %48 = vector.load %arg6[%c0_30, %c0_31] : memref<256x6xf32, #tpu.memory_space<vmem>>, vector<256x6xf32>
    %cst_32 = arith.constant dense<0.000000e+00> : vector<1x6xf32>
    %49 = tpu.matmul %47, %48, %cst_32 {dimension_numbers = #tpu.dot_dimension_numbers<[1], [0], [0], [1], [0, 0, 1, 1], [], []>} : vector<1x256xf32>, vector<256x6xf32>, vector<1x6xf32> -> vector<1x6xf32>
    %c0_33 = arith.constant 0 : index
    %c0_34 = arith.constant 0 : index
    %50 = vector.load %arg7[%c0_33, %c0_34] : memref<1x6xf32, #tpu.memory_space<vmem>>, vector<1x6xf32>
    %51 = arith.addf %49, %50 : vector<1x6xf32>
    %c0_35 = arith.constant 0 : index
    %c0_36 = arith.constant 0 : index
    %52 = vector.load %arg8[%c0_35, %c0_36] : memref<1x6xf32, #tpu.memory_space<vmem>>, vector<1x6xf32>
    tpu.vector_store %arg8[%c0_35, %c0_36], %51 {strides = array<i32>} : memref<1x6xf32, #tpu.memory_space<vmem>>, vector<1x6xf32>,
    return
  }
}

</mosaic_0001>

<bundles_post_ra>
// kernel: tile.18
= control target key start
LH: loop header
LB: loop body
LE: loop exit
PB: predicated region body
PF: predicated region fallthrough
CT: control target
= control target key end

     0   :  { %s22_s0 = inlined_call_operand.vmem [shape: f32[3], index: 0, kind: input, shape index: {}]   ;;  %s23_s1 = inlined_call_operand.vmem [shape: f32[2,3], index: 1, kind: output, shape index: {}]  }
   0x1   :  { %v4_v0 = vld [vmem:[%s22_s0] ss:$0 sm:$0xff] }
   0x2   :  { %5 = vst [vmem:[%s23_s1] sm:$0x3] %v4_v0 }

// kernel: tile.19
= control target key start
LH: loop header
LB: loop body
LE: loop exit
PB: predicated region body
PF: predicated region fallthrough
CT: control target
= control target key end

     0   :  { %s85_s0 = inlined_call_operand.vmem [shape: f32[2,3], index: 0, kind: input, shape index: {}]   ;;  %s86_s1 = inlined_call_operand.hbm [shape: f32[1,6], index: 1, kind: output, shape index: {}]  }
   0x1   :  { %v5_v0 = vld [vmem:[%s85_s0] sm:$0x3] }
   0x2   :  { %6 = vst [vmem:[#allocation3] sm:$0x3] %v5_v0 }
   0x3   :  { %2 = vsyncpa [#allocation1], 0  ;;  %vm8_vm0 = vcmask 23552   ;;  %s58_s0 = smov 3   ;;  %vm14_vm1 = vcmask 48152   ;;  %s59_s8 = smov [#allocation0]  }
   0x4   :  { %s26_s9 = sshll.u32 %s59_s8, 4  ;;  %s27_s9 = int_to_ptr.vmem [resolvable:$true] %s26_s9 }
   0x5   :  { %s34_s10 = scalar_lea.vmem %s27_s9, 16  ;;  %s38_s11 = scalar_lea.vmem %s27_s9, 32 }
   0x6   :  { %p35_p0 = scmp.ne.s32.totalorder %s27_s9, %s34_s10  ;;  %p39_p1 = scmp.lt.s32.totalorder %s27_s9, %s27_s9 }
   0x7   :  { %p40_p2 = scmp.lt.s32.totalorder %s38_s11, %s34_s10 }
   0x9   :  { %v11_v1 = vld [vmem:[#allocation3 + $0x1] sm:$0x1]   ;;  %v7_v2 = vld [vmem:[#allocation3] sm:$0x1]   ;;  %p41_p3 = por %p40_p2, %p39_p1 }
   0xa   :  { %12 = vrot.lane.b32.xlu0 %v11_v1, %s58_s0  ;;  %9 = vst.msk [vmem:[#allocation2] sm:$0x1] %vm8_vm0, %v7_v2  }
   0xb   :  { %p42_p4 = pnand %p41_p3, %p35_p0 }
  0x7c   :  { %v13_v3 = vpop.permute.xlu0 %12  }
  0x7d   :  { %15 = vst.msk [vmem:[#allocation2] sm:$0x1] %vm14_vm1, %v13_v3  }
  0x84   :  { %v19_v4 = vld [vmem:[#allocation2] sm:$0x1] }
  0x85   :  { %21 = vst [vmem:[#allocation0] sm:$0x1] %v19_v4 }
  0x86   :  { %45 = shalt.err (!%p42_p4)
}
  0x87   :  { %s46_s14 = scalar_lea.hbm %s86_s1, 16 }
  0x88   :  { %p47_p5 = scmp.ne.s32.totalorder %s86_s1, %s46_s14  ;;  %p50_p6 = scmp.lt.u32.totalorder %s46_s14, %s86_s1 }
  0x8a   :  { %p52_p7 = pnand %p50_p6, %p47_p5 }
  0x8c   :  { %55 = shalt.err (!%p52_p7)
}
  0x8d   :  { %29 = dma.vmem_to_hbm [thread:$0]  %s27_s9, 16, %s86_s1, [#allocation1]  }
  0x8e   :  { %56 = dma.done.wait [#allocation1], 16  }
  0x8f   :  { %57 = vsyncadd [#allocation1], 4294967280 }
  0x90   :  { %31 = vsyncpa [#allocation1], 1 }

// kernel: squeeze.27
= control target key start
LH: loop header
LB: loop body
LE: loop exit
PB: predicated region body
PF: predicated region fallthrough
CT: control target
= control target key end

     0   :  { %s207_s0 = inlined_call_operand.vmem [shape: f32[128], index: 0, kind: input, shape index: {}]   ;;  %s208_s1 = inlined_call_operand.hbm [shape: f32[2,8,8], index: 1, kind: output, shape index: {}]  }
   0x1   :  { %v5_v0 = vld [vmem:[%s207_s0] sm:$0x1] }
   0x2   :  { %6 = vst [vmem:[#allocation2] sm:$0x1] %v5_v0 }
   0x3   :  { %2 = vsyncpa [#allocation1], 0  ;;  %s150_s0 = smov 120   ;;  %s151_s8 = smov 104   ;;  %vm8_vm0 = vcmask 64512  }
   0x4   :  { %s152_s9 = smov 112   ;;  %s153_s10 = smov 96  }
   0x5   :  { %s154_s11 = smov 88   ;;  %s155_s12 = smov 80  }
   0x6   :  { %s156_s13 = smov 72   ;;  %s157_s14 = smov 64  }
   0x7   :  { %s158_s15 = smov 56   ;;  %s159_s16 = smov 48  }
   0x8   :  { %s160_s17 = smov 40   ;;  %s161_s18 = smov 32  }
   0x9   :  { %v10_v1 = vld [vmem:[#allocation2] sm:$0x1]   ;;  %s162_s19 = smov 24   ;;  %s163_s20 = smov 16  }
   0xa   :  { %v22_v2 = vld [vmem:[#allocation2] sm:$0x1]   ;;  %11 = vrot.lane.b32.xlu0 %v10_v1, %s150_s0  ;;  %s164_s21 = smov 8   ;;  %s165_s22 = smov [#allocation0]  }
   0xb   :  { %23 = vrot.lane.b32.xlu1 %v22_v2, %s151_s8  ;;  %v16_v3 = vld [vmem:[#allocation2] sm:$0x1]   ;;  %s104_s23 = sshll.u32 %s165_s22, 4  ;;  %s105_s23 = int_to_ptr.vmem [resolvable:$true] %s104_s23 }
   0xc   :  { %v28_v4 = vld [vmem:[#allocation2] sm:$0x1]   ;;  %s126_s24 = scalar_lea.vmem %s105_s23, 256  ;;  %p131_p1 = scmp.lt.s32.totalorder %s105_s23, %s105_s23 }
   0xd   :  { %v34_v5 = vld [vmem:[#allocation2] sm:$0x1]   ;;  %p127_p0 = scmp.ne.s32.totalorder %s105_s23, %s126_s24  ;;  %p132_p2 = scmp.lt.s32.totalorder %s126_s24, %s126_s24 }
   0xe   :  { %17 = vrot.lane.b32.xlu0 %v16_v3, %s152_s9  ;;  %v40_v6 = vld [vmem:[#allocation2] sm:$0x1]  }
   0xf   :  { %29 = vrot.lane.b32.xlu1 %v28_v4, %s153_s10  ;;  %v46_v7 = vld [vmem:[#allocation2] sm:$0x1]   ;;  %p133_p3 = por %p132_p2, %p131_p1 }
  0x10   :  { %v52_v8 = vld [vmem:[#allocation2] sm:$0x1]  }
  0x11   :  { %v58_v9 = vld [vmem:[#allocation2] sm:$0x1]   ;;  %p134_p4 = pnand %p133_p3, %p127_p0 }
  0x12   :  { %35 = vrot.lane.b32.xlu0 %v34_v5, %s154_s11  ;;  %v64_v10 = vld [vmem:[#allocation2] sm:$0x1]  }
  0x13   :  { %41 = vrot.lane.b32.xlu1 %v40_v6, %s155_s12  ;;  %v7_v11 = vld [vmem:[#allocation2] sm:$0x1]  }
  0x14   :  { %9 = vst.msk [vmem:[#allocation0] sm:$0x1] %vm8_vm0, %v7_v11   ;;  %v70_v12 = vld [vmem:[#allocation2] sm:$0x1]  }
  0x15   :  { %v76_v13 = vld [vmem:[#allocation2] sm:$0x1]  }
  0x16   :  { %47 = vrot.lane.b32.xlu0 %v46_v7, %s156_s13  ;;  %v82_v14 = vld [vmem:[#allocation2] sm:$0x1]  }
  0x17   :  { %53 = vrot.lane.b32.xlu1 %v52_v8, %s157_s14  ;;  %v88_v15 = vld [vmem:[#allocation2] sm:$0x1]  }
  0x18   :  { %v94_v16 = vld [vmem:[#allocation2] sm:$0x1]  }
  0x1a   :  { %59 = vrot.lane.b32.xlu0 %v58_v9, %s158_s15 }
  0x1b   :  { %65 = vrot.lane.b32.xlu1 %v64_v10, %s159_s16 }
  0x1e   :  { %71 = vrot.lane.b32.xlu0 %v70_v12, %s160_s17 }
  0x1f   :  { %77 = vrot.lane.b32.xlu1 %v76_v13, %s161_s18 }
  0x22   :  { %83 = vrot.lane.b32.xlu0 %v82_v14, %s162_s19 }
  0x23   :  { %89 = vrot.lane.b32.xlu1 %v88_v15, %s163_s20 }
  0x26   :  { %95 = vrot.lane.b32.xlu0 %v94_v16, %s164_s21 }
  0x7c   :  { %v12_v17 = vpop.permute.xlu0 %11  }
  0x7d   :  { %v24_v18 = vpop.permute.xlu1 %23   ;;  %15 = vst.msk [vmem:[#allocation0 + $0x1] sm:$0x1] %vm8_vm0, %v12_v17  }
  0x7e   :  { %27 = vst.msk [vmem:[#allocation0 + $0x3] sm:$0x1] %vm8_vm0, %v24_v18  }
  0x80   :  { %v18_v19 = vpop.permute.xlu0 %17  }
  0x81   :  { %v30_v20 = vpop.permute.xlu1 %29   ;;  %21 = vst.msk [vmem:[#allocation0 + $0x2] sm:$0x1] %vm8_vm0, %v18_v19  }
  0x82   :  { %33 = vst.msk [vmem:[#allocation0 + $0x4] sm:$0x1] %vm8_vm0, %v30_v20  }
  0x84   :  { %v36_v21 = vpop.permute.xlu0 %35  }
  0x85   :  { %v42_v22 = vpop.permute.xlu1 %41   ;;  %39 = vst.msk [vmem:[#allocation0 + $0x5] sm:$0x1] %vm8_vm0, %v36_v21  }
  0x86   :  { %45 = vst.msk [vmem:[#allocation0 + $0x6] sm:$0x1] %vm8_vm0, %v42_v22  }
  0x88   :  { %v48_v23 = vpop.permute.xlu0 %47  }
  0x89   :  { %v54_v24 = vpop.permute.xlu1 %53   ;;  %51 = vst.msk [vmem:[#allocation0 + $0x7] sm:$0x1] %vm8_vm0, %v48_v23  }
  0x8a   :  { %57 = vst.msk [vmem:[#allocation0 + $0x8] sm:$0x1] %vm8_vm0, %v54_v24  }
  0x8c   :  { %v60_v25 = vpop.permute.xlu0 %59  }
  0x8d   :  { %v66_v26 = vpop.permute.xlu1 %65   ;;  %63 = vst.msk [vmem:[#allocation0 + $0x9] sm:$0x1] %vm8_vm0, %v60_v25  }
  0x8e   :  { %69 = vst.msk [vmem:[#allocation0 + $0xa] sm:$0x1] %vm8_vm0, %v66_v26  }
  0x90   :  { %v72_v27 = vpop.permute.xlu0 %71  }
  0x91   :  { %v78_v28 = vpop.permute.xlu1 %77   ;;  %75 = vst.msk [vmem:[#allocation0 + $0xb] sm:$0x1] %vm8_vm0, %v72_v27  }
  0x92   :  { %81 = vst.msk [vmem:[#allocation0 + $0xc] sm:$0x1] %vm8_vm0, %v78_v28  }
  0x94   :  { %v84_v29 = vpop.permute.xlu0 %83  }
  0x95   :  { %v90_v30 = vpop.permute.xlu1 %89   ;;  %87 = vst.msk [vmem:[#allocation0 + $0xd] sm:$0x1] %vm8_vm0, %v84_v29  }
  0x96   :  { %93 = vst.msk [vmem:[#allocation0 + $0xe] sm:$0x1] %vm8_vm0, %v90_v30  }
  0x98   :  { %v96_v31 = vpop.permute.xlu0 %95  }
  0x99   :  { %99 = vst.msk [vmem:[#allocation0 + $0xf] sm:$0x1] %vm8_vm0, %v96_v31  }
  0x9a   :  { %137 = shalt.err (!%p134_p4)
}
  0x9b   :  { %s138_s27 = scalar_lea.hbm %s208_s1, 256 }
  0x9c   :  { %p139_p5 = scmp.ne.s32.totalorder %s208_s1, %s138_s27  ;;  %p142_p6 = scmp.lt.u32.totalorder %s138_s27, %s208_s1 }
  0x9e   :  { %p144_p7 = pnand %p142_p6, %p139_p5 }
  0xa0   :  { %147 = shalt.err (!%p144_p7)
}
  0xa1   :  { %107 = dma.vmem_to_hbm [thread:$0]  %s105_s23, 256, %s208_s1, [#allocation1]  }
  0xa2   :  { %148 = dma.done.wait [#allocation1], 256  }
  0xa3   :  { %149 = vsyncadd [#allocation1], 4294967040 }
  0xa4   :  { %109 = vsyncpa [#allocation1], 1 }

// kernel: tile.13
= control target key start
LH: loop header
LB: loop body
LE: loop exit
PB: predicated region body
PF: predicated region fallthrough
CT: control target
= control target key end

     0   :  { %2 = vsyncpa [#allocation1], 0  ;;  %s68_s0 = inlined_call_operand.vmem [shape: f32[128], index: 0, kind: input, shape index: {}]   ;;  %s69_s1 = inlined_call_operand.hbm [shape: f32[2,128], index: 1, kind: output, shape index: {}]  }
   0x1   :  { %v5_v0 = vld [vmem:[%s68_s0] ss:$0 sm:$0xff]  ;;  %s42_s0 = smov [#allocation0]  }
   0x2   :  { %6 = vst [vmem:[#allocation0] sm:$0x3] %v5_v0  ;;  %s11_s8 = sshll.u32 %s42_s0, 4  ;;  %s12_s8 = int_to_ptr.vmem [resolvable:$true] %s11_s8 }
   0x3   :  { %s18_s9 = scalar_lea.vmem %s12_s8, 32  ;;  %p23_p1 = scmp.lt.s32.totalorder %s12_s8, %s12_s8 }
   0x4   :  { %p19_p0 = scmp.ne.s32.totalorder %s12_s8, %s18_s9  ;;  %p24_p2 = scmp.lt.s32.totalorder %s18_s9, %s18_s9 }
   0x6   :  { %p25_p3 = por %p24_p2, %p23_p1 }
   0x8   :  { %p26_p4 = pnand %p25_p3, %p19_p0 }
   0xa   :  { %29 = shalt.err (!%p26_p4)
}
   0xb   :  { %s30_s12 = scalar_lea.hbm %s69_s1, 32 }
   0xc   :  { %p31_p5 = scmp.ne.s32.totalorder %s69_s1, %s30_s12  ;;  %p34_p6 = scmp.lt.u32.totalorder %s30_s12, %s69_s1 }
   0xe   :  { %p36_p7 = pnand %p34_p6, %p31_p5 }
  0x10   :  { %39 = shalt.err (!%p36_p7)
}
  0x11   :  { %14 = dma.vmem_to_hbm [thread:$0]  %s12_s8, 32, %s69_s1, [#allocation1]  }
  0x12   :  { %40 = dma.done.wait [#allocation1], 32  }
  0x13   :  { %41 = vsyncadd [#allocation1], 4294967264 }
  0x14   :  { %16 = vsyncpa [#allocation1], 1 }

// kernel: cu_gcn_forward.1
= control target key start
LH: loop header
LB: loop body
LE: loop exit
PB: predicated region body
PF: predicated region fallthrough
CT: control target
= control target key end

     0   :  { %13 = vsyncpa [#allocation3], 0  ;;  %s1247_s0 = inlined_call_operand.hbm [shape: f32[8,16], index: 0, kind: input, shape index: {}]   ;;  %s1248_s1 = inlined_call_operand.hbm [shape: f32[16,256], index: 1, kind: input, shape index: {}]   ;;  %s1249_s2 = inlined_call_operand.hbm [shape: f32[1,256], index: 2, kind: input, shape index: {}]   ;;  %s1250_s3 = inlined_call_operand.hbm [shape: f32[8,8], index: 3, kind: input, shape index: {}]   ;;  %s1251_s4 = inlined_call_operand.hbm [shape: f32[8,8], index: 4, kind: input, shape index: {}]   ;;  %s1252_s5 = inlined_call_operand.hbm [shape: f32[2,8,8], index: 5, kind: input, shape index: {}]   ;;  %s1253_s6 = inlined_call_operand.hbm [shape: f32[256,6], index: 6, kind: input, shape index: {}]   ;;  %s1254_s7 = inlined_call_operand.hbm [shape: f32[1,6], index: 7, kind: input, shape index: {}]   ;;  %s1255_s8 = inlined_call_operand.hbm [shape: f32[1,6], index: 8, kind: output, shape index: {}]  }
   0x1   :  { %14 = vsyncpa [#allocation6], 0 }
   0x2   :  { %15 = vsyncpa [#allocation9], 0 }
   0x3   :  { %16 = vsyncpa [#allocation12], 0 }
   0x4   :  { %17 = vsyncpa [#allocation15], 0 }
   0x5   :  { %18 = vsyncpa [#allocation4], 0  ;;  %s1058_s27 = smov [#allocation5]   ;;  %s848_s9 = scalar_lea.hbm %s1248_s1, 512 }
   0x6   :  { %s34_s28 = sshll.u32 %s1058_s27, 4  ;;  %p849_p0 = scmp.ne.s32.totalorder %s1248_s1, %s848_s9  ;;  %s35_s28 = int_to_ptr.vmem [resolvable:$true] %s34_s28 }
   0x7   :  { %p852_p1 = scmp.lt.u32.totalorder %s848_s9, %s1248_s1 }
   0x9   :  { %p854_p2 = pnand %p852_p1, %p849_p0 }
   0xb   :  { %857 = shalt.err (!%p854_p2)
}
   0xc   :  { %s858_s14 = scalar_lea.vmem %s35_s28, 512  ;;  %p863_p4 = scmp.lt.s32.totalorder %s35_s28, %s35_s28 }
   0xd   :  { %p859_p3 = scmp.ne.s32.totalorder %s35_s28, %s858_s14  ;;  %p864_p5 = scmp.lt.s32.totalorder %s858_s14, %s858_s14 }
   0xf   :  { %p865_p6 = por %p864_p5, %p863_p4 }
  0x11   :  { %p866_p7 = pnand %p865_p6, %p859_p3 }
  0x13   :  { %869 = shalt.err (!%p866_p7)
}
  0x14   :  { %s1059_s15 = smov 256   ;;  %s1060_s16 = smov 16  }
  0x15   :  { %40 = dma.hbm_to_vmem [thread:$0]  %s1248_s1, 512, %s35_s28, [#allocation6], %s1059_s15, %s1059_s15, %s1060_s16  }
  0x16   :  { %s1061_s19 = smov [#allocation8]   ;;  %s1062_s21 = smov [#allocation11]  }
  0x17   :  { %s57_s20 = sshll.u32 %s1061_s19, 4  ;;  %s76_s22 = sshll.u32 %s1062_s21, 4  ;;  %s58_s20 = int_to_ptr.vmem [resolvable:$true] %s57_s20  ;;  %s77_s22 = int_to_ptr.vmem [resolvable:$true] %s76_s22 }
  0x18   :  { %s870_s25 = scalar_lea.hbm %s1250_s3, 128 }
  0x19   :  { %p871_p8 = scmp.ne.s32.totalorder %s1250_s3, %s870_s25  ;;  %p874_p9 = scmp.lt.u32.totalorder %s870_s25, %s1250_s3 }
  0x1b   :  { %p876_p10 = pnand %p874_p9, %p871_p8 }
  0x1d   :  { %879 = shalt.err (!%p876_p10)
}
  0x1e   :  { %s880_s1 = scalar_lea.vmem %s58_s20, 128  ;;  %p885_p12 = scmp.lt.s32.totalorder %s58_s20, %s58_s20 }
  0x1f   :  { %p881_p11 = scmp.ne.s32.totalorder %s58_s20, %s880_s1  ;;  %p886_p13 = scmp.lt.s32.totalorder %s880_s1, %s880_s1 }
  0x21   :  { %p887_p0 = por %p886_p13, %p885_p12 }
  0x23   :  { %p888_p1 = pnand %p887_p0, %p881_p11 }
  0x25   :  { %891 = shalt.err (!%p888_p1)
}
  0x26   :  { %60 = dma.hbm_to_vmem [thread:$0]  %s1250_s3, 128, %s58_s20, [#allocation9]  }
  0x27   :  { %s892_s12 = scalar_lea.hbm %s1252_s5, 256 }
  0x28   :  { %p893_p2 = scmp.ne.s32.totalorder %s1252_s5, %s892_s12  ;;  %p896_p3 = scmp.lt.u32.totalorder %s892_s12, %s1252_s5 }
  0x2a   :  { %p898_p4 = pnand %p896_p3, %p893_p2 }
  0x2c   :  { %901 = shalt.err (!%p898_p4)
}
  0x2d   :  { %s902_s17 = scalar_lea.vmem %s77_s22, 256  ;;  %p907_p6 = scmp.lt.s32.totalorder %s77_s22, %s77_s22 }
  0x2e   :  { %p903_p5 = scmp.ne.s32.totalorder %s77_s22, %s902_s17  ;;  %p908_p7 = scmp.lt.s32.totalorder %s902_s17, %s902_s17 }
  0x30   :  { %p909_p8 = por %p908_p7, %p907_p6 }
  0x32   :  { %p910_p9 = pnand %p909_p8, %p903_p5 }
  0x34   :  { %913 = shalt.err (!%p910_p9)
}
  0x35   :  { %s1063_s3 = smov 128   ;;  %s1064_s18 = smov 8  }
  0x36   :  { %82 = dma.hbm_to_vmem [thread:$0]  %s1252_s5, 256, %s77_s22, [#allocation12], %s1063_s3, %s1063_s3, %s1064_s18  }
  0x37   :  { %s1065_s21 = smov [#allocation2]   ;;  %s1066_s24 = smov [#allocation7]  }
  0x38   :  { %s25_s23 = sshll.u32 %s1065_s21, 4  ;;  %s47_s25 = sshll.u32 %s1066_s24, 4  ;;  %s26_s23 = int_to_ptr.vmem [resolvable:$true] %s25_s23  ;;  %s48_s25 = int_to_ptr.vmem [resolvable:$true] %s47_s25 }
  0x39   :  { %s914_s29 = scalar_lea.hbm %s1247_s0, 128 }
  0x3a   :  { %p915_p10 = scmp.ne.s32.totalorder %s1247_s0, %s914_s29  ;;  %p918_p11 = scmp.lt.u32.totalorder %s914_s29, %s1247_s0 }
  0x3c   :  { %p920_p12 = pnand %p918_p11, %p915_p10 }
  0x3e   :  { %923 = shalt.err (!%p920_p12)
}
  0x3f   :  { %s924_s5 = scalar_lea.vmem %s26_s23, 128  ;;  %p929_p0 = scmp.lt.s32.totalorder %s26_s23, %s26_s23 }
  0x40   :  { %p925_p13 = scmp.ne.s32.totalorder %s26_s23, %s924_s5  ;;  %p930_p1 = scmp.lt.s32.totalorder %s924_s5, %s924_s5 }
  0x42   :  { %p931_p2 = por %p930_p1, %p929_p0 }
  0x44   :  { %p932_p3 = pnand %p931_p2, %p925_p13 }
  0x46   :  { %935 = shalt.err (!%p932_p3)
}
  0x47   :  { %28 = dma.hbm_to_vmem [thread:$0]  %s1247_s0, 128, %s26_s23, [#allocation3]  }
  0x48   :  { %s936_s13 = scalar_lea.hbm %s1249_s2, 32 }
  0x49   :  { %p937_p4 = scmp.ne.s32.totalorder %s1249_s2, %s936_s13  ;;  %p940_p5 = scmp.lt.u32.totalorder %s936_s13, %s1249_s2 }
  0x4b   :  { %p942_p6 = pnand %p940_p5, %p937_p4 }
  0x4d   :  { %945 = shalt.err (!%p942_p6)
}
  0x4e   :  { %s946_s19 = scalar_lea.vmem %s48_s25, 32  ;;  %p951_p8 = scmp.lt.s32.totalorder %s48_s25, %s48_s25 }
  0x4f   :  { %p947_p7 = scmp.ne.s32.totalorder %s48_s25, %s946_s19  ;;  %p952_p9 = scmp.lt.s32.totalorder %s946_s19, %s946_s19 }
  0x51   :  { %p953_p10 = por %p952_p9, %p951_p8 }
  0x53   :  { %p954_p11 = pnand %p953_p10, %p947_p7 }
  0x55   :  { %957 = shalt.err (!%p954_p11)
}
  0x56   :  { %50 = dma.hbm_to_vmem [thread:$0]  %s1249_s2, 32, %s48_s25, [#allocation6]  }
  0x57   :  { %s1067_s21 = smov [#allocation10]   ;;  %s1068_s24 = smov [#allocation13]  }
  0x58   :  { %s67_s23 = sshll.u32 %s1067_s21, 4  ;;  %s88_s26 = sshll.u32 %s1068_s24, 4  ;;  %s68_s23 = int_to_ptr.vmem [resolvable:$true] %s67_s23  ;;  %s89_s26 = int_to_ptr.vmem [resolvable:$true] %s88_s26 }
  0x59   :  { %s958_s30 = scalar_lea.hbm %s1251_s4, 128 }
  0x5a   :  { %p959_p12 = scmp.ne.s32.totalorder %s1251_s4, %s958_s30  ;;  %p962_p13 = scmp.lt.u32.totalorder %s958_s30, %s1251_s4 }
  0x5c   :  { %p964_p0 = pnand %p962_p13, %p959_p12 }
  0x5e   :  { %967 = shalt.err (!%p964_p0)
}
  0x5f   :  { %s968_s2 = scalar_lea.vmem %s68_s23, 128  ;;  %p973_p2 = scmp.lt.s32.totalorder %s68_s23, %s68_s23 }
  0x60   :  { %p969_p1 = scmp.ne.s32.totalorder %s68_s23, %s968_s2  ;;  %p974_p3 = scmp.lt.s32.totalorder %s968_s2, %s968_s2 }
  0x62   :  { %p975_p4 = por %p974_p3, %p973_p2 }
  0x64   :  { %p976_p5 = pnand %p975_p4, %p969_p1 }
  0x66   :  { %979 = shalt.err (!%p976_p5)
}
  0x67   :  { %70 = dma.hbm_to_vmem [thread:$0]  %s1251_s4, 128, %s68_s23, [#allocation9]  }
  0x68   :  { %s980_s12 = scalar_lea.hbm %s1253_s6, 4096 }
  0x69   :  { %p981_p6 = scmp.ne.s32.totalorder %s1253_s6, %s980_s12  ;;  %p984_p7 = scmp.lt.u32.totalorder %s980_s12, %s1253_s6 }
  0x6b   :  { %p986_p8 = pnand %p984_p7, %p981_p6 }
  0x6d   :  { %989 = shalt.err (!%p986_p8)
}
  0x6e   :  { %s990_s17 = scalar_lea.vmem %s89_s26, 4096  ;;  %p995_p10 = scmp.lt.s32.totalorder %s89_s26, %s89_s26 }
  0x6f   :  { %p991_p9 = scmp.ne.s32.totalorder %s89_s26, %s990_s17  ;;  %p996_p11 = scmp.lt.s32.totalorder %s990_s17, %s990_s17 }
  0x71   :  { %p997_p12 = por %p996_p11, %p995_p10 }
  0x73   :  { %p998_p13 = pnand %p997_p12, %p991_p9 }
  0x75   :  { %1001 = shalt.err (!%p998_p13)
}
  0x76   :  { %94 = dma.hbm_to_vmem [thread:$0]  %s1253_s6, 4096, %s89_s26, [#allocation12], %s1063_s3, %s1063_s3, %s1064_s18  }
  0x77   :  { %s1069_s0 = smov [#allocation14]   ;;  %s1002_s24 = scalar_lea.hbm %s1254_s7, 16 }
  0x78   :  { %s101_s20 = sshll.u32 %s1069_s0, 4  ;;  %p1003_p0 = scmp.ne.s32.totalorder %s1254_s7, %s1002_s24  ;;  %s102_s20 = int_to_ptr.vmem [resolvable:$true] %s101_s20 }
  0x79   :  { %p1006_p1 = scmp.lt.u32.totalorder %s1002_s24, %s1254_s7 }
  0x7b   :  { %p1008_p2 = pnand %p1006_p1, %p1003_p0 }
  0x7d   :  { %1011 = shalt.err (!%p1008_p2)
}
  0x7e   :  { %s1012_s28 = scalar_lea.vmem %s102_s20, 16  ;;  %s1016_s6 = scalar_lea.vmem %s102_s20, 32 }
  0x7f   :  { %p1013_p3 = scmp.ne.s32.totalorder %s102_s20, %s1012_s28  ;;  %p1017_p4 = scmp.lt.s32.totalorder %s102_s20, %s102_s20 }
  0x80   :  { %p1018_p5 = scmp.lt.s32.totalorder %s1016_s6, %s1012_s28 }
  0x82   :  { %p1019_p6 = por %p1018_p5, %p1017_p4 }
  0x84   :  { %p1020_p7 = pnand %p1019_p6, %p1013_p3 }
  0x86   :  { %1023 = shalt.err (!%p1020_p7)
}
  0x87   :  { %104 = dma.hbm_to_vmem [thread:$0]  %s1254_s7, 16, %s102_s20, [#allocation15]  }
  0x88   :  { %1046 = dma.done.wait [#allocation3], 128  }
  0x89   :  { %1047 = vsyncadd [#allocation3], 4294967168 }
  0x8a   :  { %1048 = dma.done.wait [#allocation6], 544  }
  0x8b   :  { %1049 = vsyncadd [#allocation6], 4294966752 }
  0x8c   :  { %1050 = dma.done.wait [#allocation9], 256  }
  0x8d   :  { %1051 = vsyncadd [#allocation9], 4294967040 }
  0x8e   :  { %1052 = dma.done.wait [#allocation12], 4352  }
  0x8f   :  { %1053 = vsyncadd [#allocation12], 4294962944 }
  0x90   :  { %1054 = dma.done.wait [#allocation15], 16  }
  0x91   :  { %1055 = vsyncadd [#allocation15], 4294967280  ;;  %v1070_v0 = vmov 0.0   ;;  %v132_v1 = vld [vmem:[#allocation5 + $0x8] sm:$0xff]  ;;  %v134_v2 = vld [vmem:[#allocation5 + $0x18] sm:$0xff]  ;;  %vm135_vm0 = vcmask 130048  }
  0x92   :  { %203 = vmatprep.mubr.f32.mxu0 %v1070_v0  ;;  %v131_v3 = vld [vmem:[#allocation5] sm:$0xff]  ;;  %v797_v4 = vpack.c.bf16 %v134_v2, %v132_v1  ;;  %v133_v5 = vld [vmem:[#allocation5 + $0x10] sm:$0xff]  ;;  %v130_v7 = vld [vmem:[#allocation2] sm:$0xff]  ;;  %vm214_vm1 = vcmask 64512   ;;  %s1072_s7 = smov [#allocation16]   ;;  %vm735_vm2 = vcmask 40960  }
  0x93   :  { %v799_v6 = vpack.c.bf16 %v133_v5, %v131_v3  ;;  %v129_v8 = vld [vmem:[#allocation8] sm:$0xff]  ;;  %v210_v9 = vld [vmem:[#allocation10] sm:$0xff]  ;;  %v385_v25 = vld [vmem:[#allocation11] sm:$0xff]  ;;  %s743_s26 = sshll.u32 %s1072_s7, 4  ;;  %s744_s26 = int_to_ptr.vmem [resolvable:$true] %s743_s26 }
  0x94   :  { %798 = vmatprep.subr.bf16.mxu0 %v797_v4  ;;  %v211_v11 = vmul.f32 %v210_v9, %v129_v8  ;;  %v386_v30 = vmul.f32 %v385_v25, %v129_v8  ;;  %v472_v31 = vld [vmem:[#allocation11 + $0x8] sm:$0xff]  ;;  %v648_v33 = vld [vmem:[#allocation13 + $0x80] sm:$0xff]  ;;  %v649_v34 = vld [vmem:[#allocation13 + $0x88] sm:$0xff]  ;;  %s1024_s9 = scalar_lea.vmem %s744_s26, 16  ;;  %s1028_s5 = scalar_lea.vmem %s744_s26, 32 }
  0x95   :  { %800 = vmatpush1.bf16.msra.mxu0 %v799_v6  ;;  %v473_v32 = vmul.f32 %v472_v31, %v129_v8  ;;  %v632_v35 = vld [vmem:[#allocation13] sm:$0xff]  ;;  %v801_v36 = vpack.c.bf16 %v649_v34, %v648_v33  ;;  %v633_v37 = vld [vmem:[#allocation13 + $0x8] sm:$0xff]  ;;  %v650_v38 = vld [vmem:[#allocation13 + $0x90] sm:$0xff]  ;;  %p1025_p8 = scmp.ne.s32.totalorder %s744_s26, %s1024_s9  ;;  %p1029_p9 = scmp.lt.s32.totalorder %s744_s26, %s744_s26 }
  0x96   :  { %v651_v39 = vld [vmem:[#allocation13 + $0x98] sm:$0xff]  ;;  %v803_v40 = vpack.c.bf16 %v633_v37, %v632_v35  ;;  %v634_v42 = vld [vmem:[#allocation13 + $0x10] sm:$0xff]  ;;  %v652_v44 = vld [vmem:[#allocation13 + $0xa0] sm:$0xff]  ;;  %p1030_p10 = scmp.lt.s32.totalorder %s1028_s5, %s1024_s9 }
  0x97   :  { %v805_v41 = vpack.c.bf16 %v651_v39, %v650_v38  ;;  %v635_v43 = vld [vmem:[#allocation13 + $0x18] sm:$0xff]  ;;  %802 = vmatprep.subr.bf16.mxu1 %v801_v36  ;;  %v653_v45 = vld [vmem:[#allocation13 + $0xa8] sm:$0xff]  ;;  %v636_v48 = vld [vmem:[#allocation13 + $0x20] sm:$0xff] }
  0x98   :  { %756 = vmatmul.mubr.msk.f32.vlgmr.msra.gmra.mrb[0].mxu0 %vm135_vm0, %v130_v7  ;;  %804 = vmatpush3.bf16.msra.mxu1 %v803_v40  ;;  %v807_v46 = vpack.c.bf16 %v635_v43, %v634_v42  ;;  %v809_v47 = vpack.c.bf16 %v653_v45, %v652_v44  ;;  %v637_v49 = vld [vmem:[#allocation13 + $0x28] sm:$0xff]  ;;  %v654_v50 = vld [vmem:[#allocation13 + $0xb0] sm:$0xff]  ;;  %v655_v51 = vld [vmem:[#allocation13 + $0xb8] sm:$0xff]  ;;  %p1031_p11 = por %p1030_p10, %p1029_p9 }
  0x99   :  { %282 = vmatprep.mubr.f32.mxu0 %v1070_v0  ;;  %806 = vmatprep.subr.bf16.mxu1 %v805_v41  ;;  %v811_v52 = vpack.c.bf16 %v637_v49, %v636_v48  ;;  %v813_v53 = vpack.c.bf16 %v655_v51, %v654_v50  ;;  %v638_v54 = vld [vmem:[#allocation13 + $0x30] sm:$0xff]  ;;  %v639_v55 = vld [vmem:[#allocation13 + $0x38] sm:$0xff]  ;;  %v656_v56 = vld [vmem:[#allocation13 + $0xc0] sm:$0xff] }
  0x9a   :  { %v657_v57 = vld [vmem:[#allocation13 + $0xc8] sm:$0xff]  ;;  %v815_v58 = vpack.c.bf16 %v639_v55, %v638_v54  ;;  %v640_v60 = vld [vmem:[#allocation13 + $0x40] sm:$0xff]  ;;  %v658_v62 = vld [vmem:[#allocation13 + $0xd0] sm:$0xff]  ;;  %p1032_p12 = pnand %p1031_p11, %p1025_p8 }
  0x9b   :  { %v817_v59 = vpack.c.bf16 %v657_v57, %v656_v56  ;;  %v641_v61 = vld [vmem:[#allocation13 + $0x48] sm:$0xff]  ;;  %v659_v63 = vld [vmem:[#allocation13 + $0xd8] sm:$0xff]  ;;  %v642_v2 = vld [vmem:[#allocation13 + $0x50] sm:$0xff] }
  0x9c   :  { %808 = vmatpush3.bf16.msra.mxu1 %v807_v46  ;;  %v821_v1 = vpack.c.bf16 %v659_v63, %v658_v62  ;;  %v643_v3 = vld [vmem:[#allocation13 + $0x58] sm:$0xff]  ;;  %v660_v4 = vld [vmem:[#allocation13 + $0xe0] sm:$0xff]  ;;  %v661_v5 = vld [vmem:[#allocation13 + $0xe8] sm:$0xff] }
  0x9d   :  { %810 = vmatprep.subr.bf16.mxu1 %v809_v47  ;;  %v823_v6 = vpack.c.bf16 %v643_v3, %v642_v2  ;;  %v825_v7 = vpack.c.bf16 %v661_v5, %v660_v4  ;;  %v645_v9 = vld [vmem:[#allocation13 + $0x68] sm:$0xff]  ;;  %v646_v46 = vld [vmem:[#allocation13 + $0x70] sm:$0xff]  ;;  %v647_v47 = vld [vmem:[#allocation13 + $0x78] sm:$0xff] }
  0x9e   :  { %v831_v48 = vpack.c.bf16 %v647_v47, %v646_v46 }
  0xa0   :  { %812 = vmatpush3.bf16.msra.mxu1 %v811_v52  ;;  %v664_v52 = vld [vmem:[#allocation14] sm:$0x1] }
  0xa1   :  { %814 = vmatprep.subr.bf16.mxu1 %v813_v53 }
  0xa4   :  { %816 = vmatpush3.bf16.msra.mxu1 %v815_v58 }
  0xa5   :  { %818 = vmatprep.subr.bf16.mxu1 %v817_v59 }
 0x16b   :  { %v205_v10 = vpop.f32.mrb[0].mxu0 }
 0x16c   :  { %v207_v12 = vpop.f32.mrb[1].mxu0  ;;  %v212_v14 = vmul.f32 0.1, %v205_v10 }
 0x16d   :  { %218 = vmatprep.subr.mxu0 %v207_v12  ;;  %v213_v17 = vmul.f32 0.1, %v207_v12 }
 0x16e   :  { %219 = vmatpush1.msra.mxu0 %v205_v10  ;;  %v662_v10 = vld [vmem:[#allocation13 + $0xf0] sm:$0xff] }
 0x16f   :  { %757 = vmatmul.mubr.msk.f32.vlgmr.msra.gmra.mrb[2].mxu0 %vm214_vm1, %v211_v11  ;;  %v663_v11 = vld [vmem:[#allocation13 + $0xf8] sm:$0xff] }
 0x170   :  { %362 = vmatprep.mubr.f32.mxu0 %v1070_v0 }
 0x242   :  { %v284_v13 = vpop.f32.mrb[2].mxu0 }
 0x243   :  { %v289_v15 = vmul.f32 0.45, %v284_v13  ;;  %v286_v16 = vpop.f32.mrb[3].mxu0  ;;  %v829_v13 = vpack.c.bf16 %v663_v11, %v662_v10 }
 0x244   :  { %v290_v18 = vmul.f32 0.45, %v286_v16 }
 0x245   :  { %v291_v19 = vadd.f32 %v289_v15, %v212_v14  ;;  %v375_v14 = vlaneseq }
 0x246   :  { %v292_v20 = vadd.f32 %v290_v18, %v213_v17  ;;  %v373_v17 = vld [vmem:[#allocation7] sm:$0x3] }
 0x247   :  { %v293_v22 = vmul.f32 0.1, %v291_v19  ;;  %v376_v15 = vshrl.u32 %v375_v14, 7 }
 0x248   :  { %298 = vmatprep.subr.mxu0 %v292_v20  ;;  %v294_v26 = vmul.f32 0.1, %v292_v20 }
 0x249   :  { %299 = vmatpush1.msra.mxu0 %v291_v19  ;;  %v377_v16 = vsub.s32 0, %v376_v15  ;;  %v381_v18 = vsub.s32 1, %v376_v15 }
 0x24a   :  { %758 = vmatmul.mubr.msk.f32.vlgmr.msra.gmra.mrb[4].mxu0 %vm214_vm1, %v129_v8  ;;  %v644_v8 = vld [vmem:[#allocation13 + $0x60] sm:$0xff] }
 0x24b   :  { %456 = vmatprep.mubr.f32.mxu0 %v1070_v0  ;;  %v827_v12 = vpack.c.bf16 %v645_v9, %v644_v8  ;;  %v378_v20 = vrot.slane %v373_v17, %v377_v16 }
 0x31d   :  { %v364_v21 = vpop.f32.mrb[4].mxu0 }
 0x31e   :  { %v369_v23 = vmul.f32 0.45, %v364_v21  ;;  %v366_v24 = vpop.f32.mrb[5].mxu0 }
 0x31f   :  { %v370_v27 = vmul.f32 0.45, %v366_v24  ;;  %v382_v24 = vrot.slane %v373_v17, %v381_v18 }
 0x320   :  { %v1222_v28 = vadd.f32 %v369_v23, %v293_v22 }
 0x321   :  { %v1224_v29 = vadd.f32 %v370_v27, %v294_v26 }
 0x322   :  { %v387_v21 = vmul.f32 0.1, %v1222_v28 }
 0x323   :  { %392 = vmatprep.subr.mxu0 %v1224_v29  ;;  %v388_v25 = vmul.f32 0.1, %v1224_v29 }
 0x324   :  { %393 = vmatpush1.msra.mxu0 %v1222_v28 }
 0x325   :  { %759 = vmatmul.mubr.msk.f32.vlgmr.msra.gmra.mrb[6].mxu0 %vm214_vm1, %v386_v30  ;;  %477 = vmatprep.subr.mxu0 %v1224_v29  ;;  %v1071_v29 = vmov 1.0  }
 0x326   :  { %478 = vmatpush1.msra.mxu0 %v1222_v28  ;;  %541 = vmatprep.mubr.f32.mxu0 %v1070_v0 }
 0x329   :  { %760 = vmatmul.mubr.msk.f32.vlgmr.msra.gmra.mrb[8].mxu0 %vm214_vm1, %v473_v32 }
 0x32a   :  { %625 = vmatprep.mubr.f32.mxu0 %v1070_v0  ;;  %v819_v0 = vpack.c.bf16 %v641_v61, %v640_v60 }
 0x32c   :  { %820 = vmatpush3.bf16.msra.mxu1 %v819_v0 }
 0x32d   :  { %822 = vmatprep.subr.bf16.mxu1 %v821_v1 }
 0x330   :  { %824 = vmatpush3.bf16.msra.mxu1 %v823_v6 }
 0x331   :  { %826 = vmatprep.subr.bf16.mxu1 %v825_v7 }
 0x334   :  { %828 = vmatpush3.bf16.msra.mxu1 %v827_v12 }
 0x335   :  { %830 = vmatprep.subr.bf16.mxu1 %v829_v13 }
 0x338   :  { %832 = vmatpush3.bf16.msra.mxu1 %v831_v48 }
 0x3f8   :  { %v458_v19 = vpop.f32.mrb[6].mxu0 }
 0x3f9   :  { %v463_v22 = vmul.f32 0.45, %v458_v19  ;;  %v460_v23 = vpop.f32.mrb[7].mxu0 }
 0x3fa   :  { %v464_v26 = vmul.f32 0.45, %v460_v23 }
 0x3fb   :  { %v465_v27 = vadd.f32 %v463_v22, %v387_v21 }
 0x3fc   :  { %v466_v30 = vadd.f32 %v464_v26, %v388_v25  ;;  %v543_v31 = vpop.f32.mrb[8].mxu0 }
 0x3fd   :  { %v467_v32 = vadd.f32 %v465_v27, %v378_v20  ;;  %v548_v33 = vmul.f32 0.45, %v543_v31  ;;  %v545_v34 = vpop.f32.mrb[9].mxu0 }
 0x3fe   :  { %v468_v35 = vadd.f32 %v466_v30, %v382_v24  ;;  %v549_v36 = vmul.f32 0.45, %v545_v34 }
 0x3ff   :  { %v550_v37 = vadd.f32 %v548_v33, %v387_v21  ;;  %v469_v39 = vmax.f32 %v467_v32, 0.0 }
 0x400   :  { %v551_v38 = vadd.f32 %v549_v36, %v388_v25  ;;  %v470_v41 = vmax.f32 %v468_v35, 0.0 }
 0x401   :  { %v552_v40 = vadd.f32 %v550_v37, %v378_v20 }
 0x402   :  { %v553_v28 = vadd.f32 %v551_v38, %v382_v24 }
 0x403   :  { %v554_v42 = vadd.f32 %v552_v40, %v469_v39 }
 0x404   :  { %v555_v43 = vadd.f32 %v553_v28, %v470_v41 }
 0x405   :  { %v556_v45 = vmax.f32 %v554_v42, 0.0 }
 0x406   :  { %v557_v44 = vmax.f32 %v555_v43, 0.0 }
 0x408   :  { %561 = vmatprep.subr.mxu0 %v557_v44 }
 0x409   :  { %562 = vmatpush1.msra.mxu0 %v556_v45 }
 0x40a   :  { %761 = vmatmul.mubr.msk.f32.vlgmr.msra.gmra.mrb[10].mxu0 %vm214_vm1, %v1071_v29 }
 0x4dd   :  { %v627_v49 = vpop.f32.mrb[10].mxu0 }
 0x4de   :  { %v629_v50 = vpop.f32.mrb[11].mxu0 }
 0x4df   :  { %729 = vmatprep.mubr.f32.mxu1 %v629_v50 }
 0x4e0   :  { %730 = vmatmul.mubr.f32.vlgmr.msra.gmra.mrb[0].mxu1 %v627_v49 }
 0x5b3   :  { %v794_v51 = vpop.f32.mrb[0].mxu1 }
 0x5b4   :  { %v795_v53 = vpop.f32.mrb[1].mxu1 }
 0x5b5   :  { %v796_v54 = vadd.f32 %v795_v53, %v794_v51 }
 0x5b7   :  { %v732_v55 = vadd.f32 %v796_v54, %v664_v52 }
 0x5b9   :  { %736 = vst.msk [vmem:[#allocation16] sm:$0x1] %vm735_vm2, %v732_v55 }
 0x5ba   :  { %1035 = shalt.err (!%p1032_p12)
}
 0x5bb   :  { %s1036_s22 = scalar_lea.hbm %s1255_s8, 16 }
 0x5bc   :  { %p1037_p13 = scmp.ne.s32.totalorder %s1255_s8, %s1036_s22  ;;  %p1040_p0 = scmp.lt.u32.totalorder %s1036_s22, %s1255_s8 }
 0x5be   :  { %p1042_p1 = pnand %p1040_p0, %p1037_p13 }
 0x5c0   :  { %1045 = shalt.err (!%p1042_p1)
}
 0x5c1   :  { %746 = dma.vmem_to_hbm [thread:$0]  %s744_s26, 16, %s1255_s8, [#allocation4]  }
 0x5c2   :  { %1056 = dma.done.wait [#allocation4], 16  }
 0x5c3   :  { %1057 = vsyncadd [#allocation4], 4294967280 }
 0x5c4   :  { %750 = vsyncpa [#allocation3], 1 }
 0x5c5   :  { %751 = vsyncpa [#allocation6], 1 }
 0x5c6   :  { %752 = vsyncpa [#allocation9], 1 }
 0x5c7   :  { %753 = vsyncpa [#allocation12], 1 }
 0x5c8   :  { %754 = vsyncpa [#allocation15], 1 }
 0x5c9   :  { %755 = vsyncpa [#allocation4], 1 }

</bundles_post_ra>
